<compile_context>
chip_gen: v5e
topology: v5e:2x2
jax: 0.10.0
libtpu: 0.0.40
codegen_flags: <defaults>
</compile_context>

<pallas_src>
import jax
import jax.numpy as jnp
from jax.experimental import pallas as pl
from jax.experimental.pallas import tpu as pltpu


def _round_up(v, m):
    return ((v + m - 1) // m) * m


def _pad2d(w, rows, cols, dtype=jnp.float32):
    w = jnp.asarray(w, jnp.float32)
    out = jnp.zeros((rows, cols), jnp.float32).at[: w.shape[0], : w.shape[1]].set(w)
    return out.astype(dtype)


def _pick_tile(n):
    # Largest tile that still leaves >= 2 row blocks (v7x has 2 TensorCores);
    # minimum 128 to satisfy the (8, 128) lane constraint on the A tile.
    for t in (1024, 512, 256, 128):
        if n >= 2 * t:
            return t
    return 128


# --------------------------- SAGEConv layer kernel ---------------------------
def sage_layer_kernel(cid_ref, cnt_ref, a_ref, hk_ref, hs_ref, invdeg_ref,
                      wl_ref, wr_ref, b_ref, out_ref, acc_ref):
    i = pl.program_id(0)
    k = pl.program_id(1)

    @pl.when(k == 0)
    def _():
        acc_ref[...] = jnp.zeros_like(acc_ref)

    # Block-sparse: only accumulate for the nonzero A tiles of this row block
    # (padded k steps are remapped to the last valid tile and skipped here).
    @pl.when(k < cnt_ref[i])
    def _():
        acc_ref[...] += jnp.dot(a_ref[...], hk_ref[...],
                                preferred_element_type=jnp.float32)

    @pl.when(k == pl.num_programs(1) - 1)
    def _():
        # Mean aggregation: 1/deg applied to the f32 accumulator, then the
        # projection as two bf16 MXU dots (no lane concatenate):
        #   out = agg @ Wl + x_self @ Wr + b ; ReLU ; dropout = identity (eval)
        agg = (acc_ref[...] * invdeg_ref[...]).astype(jnp.bfloat16)
        out = (jnp.dot(agg, wl_ref[...], preferred_element_type=jnp.float32)
               + jnp.dot(hs_ref[...], wr_ref[...], preferred_element_type=jnp.float32)
               + b_ref[...])
        out_ref[...] = jnp.maximum(out, 0.0).astype(out_ref.dtype)


def _sage_layer(col_ids, cnt, a01, h_bf16, inv_deg, wl, wr, bias, tm, tk):
    n_pad, f_in = h_bf16.shape
    f_out = wl.shape[1]
    nbi = n_pad // tm
    nbk = n_pad // tk

    return pl.pallas_call(
        sage_layer_kernel,
        out_shape=jax.ShapeDtypeStruct((n_pad, f_out), jnp.bfloat16),
        grid_spec=pltpu.PrefetchScalarGridSpec(
            num_scalar_prefetch=2,
            grid=(nbi, nbk),
            in_specs=[
                # A tile (bf16 0/1), k remapped through the nonzero-tile list
                pl.BlockSpec((tm, tk),
                             lambda i, k, cid, cnt: (i, cid[i * nbk + k])),
                # H neighbor k-block (bf16), same remap
                pl.BlockSpec((tk, f_in),
                             lambda i, k, cid, cnt: (cid[i * nbk + k], 0)),
                # H self block (bf16)
                pl.BlockSpec((tm, f_in), lambda i, k, cid, cnt: (i, 0)),
                # 1/deg (f32)
                pl.BlockSpec((tm, 1), lambda i, k, cid, cnt: (i, 0)),
                # resident weights / bias
                pl.BlockSpec((f_in, f_out), lambda i, k, cid, cnt: (0, 0)),
                pl.BlockSpec((f_in, f_out), lambda i, k, cid, cnt: (0, 0)),
                pl.BlockSpec((1, f_out), lambda i, k, cid, cnt: (0, 0)),
            ],
            out_specs=pl.BlockSpec((tm, f_out), lambda i, k, cid, cnt: (i, 0)),
            scratch_shapes=[pltpu.VMEM((tm, f_in), jnp.float32)],
        ),
        compiler_params=pltpu.CompilerParams(
            dimension_semantics=("parallel", "arbitrary"),
            vmem_limit_bytes=48 * 1024 * 1024),
    )(col_ids, cnt, a01, h_bf16, h_bf16, inv_deg, wl, wr, bias)


# ------------------------ mean-pool + classifier kernel -----------------------
def pool_classify_kernel(p_ref, h_ref, wc_ref, bc_ref, out_ref, acc_ref):
    k = pl.program_id(0)

    @pl.when(k == 0)
    def _():
        acc_ref[...] = jnp.zeros_like(acc_ref)

    acc_ref[...] += jnp.dot(p_ref[...], h_ref[...],
                            preferred_element_type=jnp.float32)

    @pl.when(k == pl.num_programs(0) - 1)
    def _():
        out_ref[...] = jnp.dot(acc_ref[...], wc_ref[...],
                               preferred_element_type=jnp.float32) + bc_ref[...]


def _pool_classify(pool_mat, h_bf16, wc, bc, tk):
    b_pad, n_pad = pool_mat.shape
    h_dim = h_bf16.shape[1]
    c_dim = wc.shape[1]

    return pl.pallas_call(
        pool_classify_kernel,
        out_shape=jax.ShapeDtypeStruct((b_pad, c_dim), jnp.float32),
        grid_spec=pltpu.PrefetchScalarGridSpec(
            num_scalar_prefetch=0,
            grid=(n_pad // tk,),
            in_specs=[
                pl.BlockSpec((b_pad, tk), lambda k: (0, k)),       # pooling rows (bf16)
                pl.BlockSpec((tk, h_dim), lambda k: (k, 0)),       # node features (bf16)
                pl.BlockSpec((h_dim, c_dim), lambda k: (0, 0)),    # classifier W (f32)
                pl.BlockSpec((1, c_dim), lambda k: (0, 0)),        # classifier b (f32)
            ],
            out_specs=pl.BlockSpec((b_pad, c_dim), lambda k: (0, 0)),
            scratch_shapes=[pltpu.VMEM((b_pad, h_dim), jnp.float32)],
        ),
        compiler_params=pltpu.CompilerParams(
            dimension_semantics=("arbitrary",)),
    )(pool_mat, h_bf16, wc, bc)


# --------------------------------- wrapper -----------------------------------
def graphsage_forward(x, edge_index, batch, num_graphs, params):
    """x: (N, F) f32; edge_index: (2, E) int32 (src, dst); batch: (N,) int32."""
    n = x.shape[0]
    num_features = x.shape[1]
    hidden_dim = params["layers"][0]["wl"].shape[1]
    num_classes = params["wc"].shape[1]

    tile = _pick_tile(n)
    tm = tk = tile
    n_pad = _round_up(n, tile)
    nbi = n_pad // tm
    nbk = n_pad // tk

    # Lane-dense padded dims (pure layout plumbing, zero math change).
    f_pad = _round_up(num_features, 128)
    h_pad = _round_up(hidden_dim, 128)
    c_pad = _round_up(num_classes, 128)
    b_pad = _round_up(num_graphs, 8)

    src, dst = edge_index[0], edge_index[1]

    # --- adjacency built directly in bf16 (0/1 exact); degrees in O(E) ---
    a01 = jnp.zeros((n_pad, n_pad), jnp.bfloat16).at[dst, src].add(
        jnp.asarray(1.0, jnp.bfloat16))
    deg = jnp.zeros((n_pad, 1), jnp.float32).at[dst, 0].add(1.0)
    inv_deg = jnp.where(deg > 0, 1.0 / deg, 0.0)                 # (n_pad, 1) f32

    # --- block-sparsity metadata (O(E)) for the scalar-prefetch index_maps ---
    blk = jnp.zeros((nbi, nbk), jnp.int32).at[dst // tm, src // tk].add(1)
    nz = blk > 0
    cnt = nz.sum(axis=1).astype(jnp.int32)                       # (nbi,)
    cols = jnp.arange(nbk, dtype=jnp.int32)
    order = jnp.argsort(jnp.where(nz, cols, cols + nbk), axis=1).astype(jnp.int32)
    last = jnp.take_along_axis(order, jnp.maximum(cnt - 1, 0)[:, None], axis=1)
    col_ids = jnp.where(cols[None, :] < cnt[:, None], order, last)
    col_ids = col_ids.reshape(-1).astype(jnp.int32)              # (nbi*nbk,)

    # --- padded node features, bf16 (feeds neighbor AND self paths) ---
    h = jnp.zeros((n_pad, f_pad), jnp.float32).at[:n, :num_features].set(x)
    h = h.astype(jnp.bfloat16)

    # --- SAGE layers (each pallas_call emits bf16 activations directly) ---
    in_dim = f_pad
    for lp in params["layers"]:
        wl = _pad2d(lp["wl"], in_dim, h_pad, jnp.bfloat16)
        wr = _pad2d(lp["wr"], in_dim, h_pad, jnp.bfloat16)
        b = _pad2d(lp["bl"], 1, h_pad, jnp.float32)
        h = _sage_layer(col_ids, cnt, a01, h, inv_deg, wl, wr, b, tm, tk)
        in_dim = h_pad

    # --- mean-pooling matrix (padded graphs/nodes contribute zero rows) ---
    batch_p = jnp.full((n_pad,), -1, jnp.int32).at[:n].set(batch)
    one_hot = (batch_p[None, :] ==
               jnp.arange(b_pad, dtype=jnp.int32)[:, None]).astype(jnp.float32)
    counts = one_hot.sum(axis=1, keepdims=True)
    pool_mat = (one_hot / jnp.maximum(counts, 1.0)).astype(jnp.bfloat16)

    wc = _pad2d(params["wc"], h_pad, c_pad, jnp.float32)
    bc = _pad2d(params["bc"], 1, c_pad, jnp.float32)
    logits_p = _pool_classify(pool_mat, h, wc, bc, tk)

    return logits_p[:num_graphs, :num_classes]


def init_params(key, num_features, hidden_dim, num_classes, num_layers=2):
    keys = jax.random.split(key, 3 * num_layers + 1)
    scale = 0.1
    layers = []
    in_dim = num_features
    for l in range(num_layers):
        kwl, kbl, kwr = keys[3 * l], keys[3 * l + 1], keys[3 * l + 2]
        layers.append({
            # lin_l (with bias) on aggregated neighbors, lin_r (no bias) on self
            "wl": scale * jax.random.normal(kwl, (in_dim, hidden_dim), jnp.float32),
            "bl": scale * jax.random.normal(kbl, (1, hidden_dim), jnp.float32),
            "wr": scale * jax.random.normal(kwr, (in_dim, hidden_dim), jnp.float32),
        })
        in_dim = hidden_dim
    return {
        "layers": layers,
        "wc": scale * jax.random.normal(keys[-1], (hidden_dim, num_classes), jnp.float32),
        "bc": jnp.zeros((1, num_classes), jnp.float32),
    }


if __name__ == "__main__":
    num_features = 8
    hidden_dim = 32
    num_classes = 4
    n_nodes = 16          # two graphs of 8 nodes each
    num_graphs = 2

    key = jax.random.PRNGKey(0)
    k_x, k_p = jax.random.split(key)

    x = jax.random.normal(k_x, (n_nodes, num_features), jnp.float32)

    # Deterministic edges: a bidirectional ring within each graph of 8 nodes.
    edges = []
    for g in range(num_graphs):
        base = g * 8
        for i in range(8):
            a, b = base + i, base + (i + 1) % 8
            edges.append((a, b))
            edges.append((b, a))
    edge_index = jnp.array(edges, jnp.int32).T          # (2, E)
    batch = jnp.repeat(jnp.arange(num_graphs, dtype=jnp.int32), 8)  # (N,)

    params = init_params(k_p, num_features, hidden_dim, num_classes, num_layers=2)

    fwd = jax.jit(graphsage_forward, static_argnums=(3,))
    out = fwd(x, edge_index, batch, num_graphs, params)
    out = jax.block_until_ready(out)
    assert out.shape == (num_graphs, num_classes)
    print("KERNEL_OK")
</pallas_src>

<mosaic_0001>
module attributes {stable_mosaic.version = 11 : i64} {
  func.func @sage_layer_kernel(%arg0: i32, %arg1: i32, %arg2: memref<1xi32, #tpu.memory_space<smem>>, %arg3: memref<1xi32, #tpu.memory_space<smem>>, %arg4: memref<128x128xbf16, #tpu.memory_space<vmem>>, %arg5: memref<128x128xbf16, #tpu.memory_space<vmem>>, %arg6: memref<128x128xbf16, #tpu.memory_space<vmem>>, %arg7: memref<128x1xf32, #tpu.memory_space<vmem>>, %arg8: memref<128x128xbf16, #tpu.memory_space<vmem>>, %arg9: memref<128x128xbf16, #tpu.memory_space<vmem>>, %arg10: memref<1x128xf32, #tpu.memory_space<vmem>>, %arg11: memref<128x128xbf16, #tpu.memory_space<vmem>>, %arg12: memref<128x128xf32, #tpu.memory_space<vmem>>) attributes {dimension_semantics = [#tpu.dimension_semantics<parallel>, #tpu.dimension_semantics<arbitrary>], iteration_bounds = array<i64: 1, 1>, scalar_prefetch = 2 : i64, scratch_operands = 1 : i64, tpu.core_type = #tpu.core_type<tc>, window_params = [{transform_indices = @transform_0, window_bounds = array<i64: 128, 128>}, {transform_indices = @transform_1, window_bounds = array<i64: 128, 128>}, {transform_indices = @transform_2, window_bounds = array<i64: 128, 128>}, {transform_indices = @transform_3, window_bounds = array<i64: 128, 1>}, {pipeline_mode = #tpu.pipeline_mode<synchronous>, transform_indices = @transform_4, window_bounds = array<i64: 128, 128>}, {pipeline_mode = #tpu.pipeline_mode<synchronous>, transform_indices = @transform_5, window_bounds = array<i64: 128, 128>}, {pipeline_mode = #tpu.pipeline_mode<synchronous>, transform_indices = @transform_6, window_bounds = array<i64: 1, 128>}, {transform_indices = @transform_7, window_bounds = array<i64: 128, 128>}]} {
    %c0_i32 = arith.constant 0 : i32
    %0 = arith.cmpi eq, %arg1, %c0_i32 : i32
    %1 = arith.extui %0 : i1 to i32
    %c0_i32_0 = arith.constant 0 : i32
    %2 = arith.cmpi ne, %1, %c0_i32_0 : i32
    scf.if %2 {
      %cst = arith.constant 0.000000e+00 : f32
      %11 = vector.broadcast %cst : f32 to vector<128x128xf32>
      %c0 = arith.constant 0 : index
      %c0_4 = arith.constant 0 : index
      %12 = vector.load %arg12[%c0, %c0_4] : memref<128x128xf32, #tpu.memory_space<vmem>>, vector<128x128xf32>
      tpu.vector_store %arg12[%c0, %c0_4], %11 {strides = array<i32>} : memref<128x128xf32, #tpu.memory_space<vmem>>, vector<128x128xf32>,
    } else {
    }
    %3 = arith.index_cast %arg0 : i32 to index
    %4 = memref.load %arg3[%3] : memref<1xi32, #tpu.memory_space<smem>>
    %5 = arith.cmpi slt, %arg1, %4 : i32
    %6 = arith.extui %5 : i1 to i32
    %c0_i32_1 = arith.constant 0 : i32
    %7 = arith.cmpi ne, %6, %c0_i32_1 : i32
    scf.if %7 {
      %c0 = arith.constant 0 : index
      %c0_4 = arith.constant 0 : index
      %11 = vector.load %arg12[%c0, %c0_4] : memref<128x128xf32, #tpu.memory_space<vmem>>, vector<128x128xf32>
      %c0_5 = arith.constant 0 : index
      %c0_6 = arith.constant 0 : index
      %12 = vector.load %arg4[%c0_5, %c0_6] : memref<128x128xbf16, #tpu.memory_space<vmem>>, vector<128x128xbf16>
      %c0_7 = arith.constant 0 : index
      %c0_8 = arith.constant 0 : index
      %13 = vector.load %arg5[%c0_7, %c0_8] : memref<128x128xbf16, #tpu.memory_space<vmem>>, vector<128x128xbf16>
      %cst = arith.constant dense<0.000000e+00> : vector<128x128xf32>
      %14 = tpu.matmul %12, %13, %cst {dimension_numbers = #tpu.dot_dimension_numbers<[1], [0], [0], [1], [0, 0, 1, 1], [], []>} : vector<128x128xbf16>, vector<128x128xbf16>, vector<128x128xf32> -> vector<128x128xf32>
      %15 = arith.addf %11, %14 : vector<128x128xf32>
      %c0_9 = arith.constant 0 : index
      %c0_10 = arith.constant 0 : index
      %16 = vector.load %arg12[%c0_9, %c0_10] : memref<128x128xf32, #tpu.memory_space<vmem>>, vector<128x128xf32>
      tpu.vector_store %arg12[%c0_9, %c0_10], %15 {strides = array<i32>} : memref<128x128xf32, #tpu.memory_space<vmem>>, vector<128x128xf32>,
    } else {
    }
    %c0_i32_2 = arith.constant 0 : i32
    %8 = arith.cmpi eq, %arg1, %c0_i32_2 : i32
    %9 = arith.extui %8 : i1 to i32
    %c0_i32_3 = arith.constant 0 : i32
    %10 = arith.cmpi ne, %9, %c0_i32_3 : i32
    scf.if %10 {
      %c0 = arith.constant 0 : index
      %c0_4 = arith.constant 0 : index
      %11 = vector.load %arg12[%c0, %c0_4] : memref<128x128xf32, #tpu.memory_space<vmem>>, vector<128x128xf32>
      %c0_5 = arith.constant 0 : index
      %c0_6 = arith.constant 0 : index
      %12 = vector.load %arg7[%c0_5, %c0_6] : memref<128x1xf32, #tpu.memory_space<vmem>>, vector<128x1xf32>
      %13 = vector.broadcast %12 : vector<128x1xf32> to vector<128x128xf32>
      %14 = arith.mulf %11, %13 : vector<128x128xf32>
      %15 = arith.truncf %14 : vector<128x128xf32> to vector<128x128xbf16>
      %c0_7 = arith.constant 0 : index
      %c0_8 = arith.constant 0 : index
      %16 = vector.load %arg8[%c0_7, %c0_8] : memref<128x128xbf16, #tpu.memory_space<vmem>>, vector<128x128xbf16>
      %cst = arith.constant dense<0.000000e+00> : vector<128x128xf32>
      %17 = tpu.matmul %15, %16, %cst {dimension_numbers = #tpu.dot_dimension_numbers<[1], [0], [0], [1], [0, 0, 1, 1], [], []>} : vector<128x128xbf16>, vector<128x128xbf16>, vector<128x128xf32> -> vector<128x128xf32>
      %c0_9 = arith.constant 0 : index
      %c0_10 = arith.constant 0 : index
      %18 = vector.load %arg6[%c0_9, %c0_10] : memref<128x128xbf16, #tpu.memory_space<vmem>>, vector<128x128xbf16>
      %c0_11 = arith.constant 0 : index
      %c0_12 = arith.constant 0 : index
      %19 = vector.load %arg9[%c0_11, %c0_12] : memref<128x128xbf16, #tpu.memory_space<vmem>>, vector<128x128xbf16>
      %cst_13 = arith.constant dense<0.000000e+00> : vector<128x128xf32>
      %20 = tpu.matmul %18, %19, %cst_13 {dimension_numbers = #tpu.dot_dimension_numbers<[1], [0], [0], [1], [0, 0, 1, 1], [], []>} : vector<128x128xbf16>, vector<128x128xbf16>, vector<128x128xf32> -> vector<128x128xf32>
      %21 = arith.addf %17, %20 : vector<128x128xf32>
      %c0_14 = arith.constant 0 : index
      %c0_15 = arith.constant 0 : index
      %22 = vector.load %arg10[%c0_14, %c0_15] : memref<1x128xf32, #tpu.memory_space<vmem>>, vector<1x128xf32>
      %23 = vector.broadcast %22 : vector<1x128xf32> to vector<128x128xf32>
      %24 = arith.addf %21, %23 : vector<128x128xf32>
      %cst_16 = arith.constant 0.000000e+00 : f32
      %25 = vector.broadcast %cst_16 : f32 to vector<128x128xf32>
      %26 = arith.maximumf %24, %25 : vector<128x128xf32>
      %27 = arith.truncf %26 : vector<128x128xf32> to vector<128x128xbf16>
      %c0_17 = arith.constant 0 : index
      %c0_18 = arith.constant 0 : index
      %28 = vector.load %arg11[%c0_17, %c0_18] : memref<128x128xbf16, #tpu.memory_space<vmem>>, vector<128x128xbf16>
      tpu.vector_store %arg11[%c0_17, %c0_18], %27 {strides = array<i32>} : memref<128x128xbf16, #tpu.memory_space<vmem>>, vector<128x128xbf16>,
    } else {
    }
    return
  }
  func.func @transform_0(%arg0: i32, %arg1: i32, %arg2: memref<1xi32, #tpu.memory_space<smem>>, %arg3: memref<1xi32, #tpu.memory_space<smem>>) -> (i32, i32) {
    %c1_i32 = arith.constant 1 : i32
    %0 = arith.muli %arg0, %c1_i32 : i32
    %1 = arith.addi %0, %arg1 : i32
    %2 = arith.index_cast %1 : i32 to index
    %3 = memref.load %arg2[%2] : memref<1xi32, #tpu.memory_space<smem>>
    %c0_i32 = arith.constant 0 : i32
    return %arg0, %3 : i32, i32
  }
  func.func @transform_1(%arg0: i32, %arg1: i32, %arg2: memref<1xi32, #tpu.memory_space<smem>>, %arg3: memref<1xi32, #tpu.memory_space<smem>>) -> (i32, i32) {
    %c1_i32 = arith.constant 1 : i32
    %0 = arith.muli %arg0, %c1_i32 : i32
    %1 = arith.addi %0, %arg1 : i32
    %2 = arith.index_cast %1 : i32 to index
    %3 = memref.load %arg2[%2] : memref<1xi32, #tpu.memory_space<smem>>
    %c0_i32 = arith.constant 0 : i32
    %c0_i32_0 = arith.constant 0 : i32
    return %3, %c0_i32 : i32, i32
  }
  func.func @transform_2(%arg0: i32, %arg1: i32, %arg2: memref<1xi32, #tpu.memory_space<smem>>, %arg3: memref<1xi32, #tpu.memory_space<smem>>) -> (i32, i32) {
    %c0_i32 = arith.constant 0 : i32
    %c0_i32_0 = arith.constant 0 : i32
    return %arg0, %c0_i32 : i32, i32
  }
  func.func @transform_3(%arg0: i32, %arg1: i32, %arg2: memref<1xi32, #tpu.memory_space<smem>>, %arg3: memref<1xi32, #tpu.memory_space<smem>>) -> (i32, i32) {
    %c0_i32 = arith.constant 0 : i32
    %c0_i32_0 = arith.constant 0 : i32
    return %arg0, %c0_i32 : i32, i32
  }
  func.func @transform_4(%arg0: i32, %arg1: i32, %arg2: memref<1xi32, #tpu.memory_space<smem>>, %arg3: memref<1xi32, #tpu.memory_space<smem>>) -> (i32, i32) {
    %c0_i32 = arith.constant 0 : i32
    %c0_i32_0 = arith.constant 0 : i32
    %c0_i32_1 = arith.constant 0 : i32
    return %c0_i32, %c0_i32_0 : i32, i32
  }
  func.func @transform_5(%arg0: i32, %arg1: i32, %arg2: memref<1xi32, #tpu.memory_space<smem>>, %arg3: memref<1xi32, #tpu.memory_space<smem>>) -> (i32, i32) {
    %c0_i32 = arith.constant 0 : i32
    %c0_i32_0 = arith.constant 0 : i32
    %c0_i32_1 = arith.constant 0 : i32
    return %c0_i32, %c0_i32_0 : i32, i32
  }
  func.func @transform_6(%arg0: i32, %arg1: i32, %arg2: memref<1xi32, #tpu.memory_space<smem>>, %arg3: memref<1xi32, #tpu.memory_space<smem>>) -> (i32, i32) {
    %c0_i32 = arith.constant 0 : i32
    %c0_i32_0 = arith.constant 0 : i32
    %c0_i32_1 = arith.constant 0 : i32
    return %c0_i32, %c0_i32_0 : i32, i32
  }
  func.func @transform_7(%arg0: i32, %arg1: i32, %arg2: memref<1xi32, #tpu.memory_space<smem>>, %arg3: memref<1xi32, #tpu.memory_space<smem>>) -> (i32, i32) {
    %c0_i32 = arith.constant 0 : i32
    %c0_i32_0 = arith.constant 0 : i32
    return %arg0, %c0_i32 : i32, i32
  }
}

module attributes {stable_mosaic.version = 11 : i64} {
  func.func @pool_classify_kernel(%arg0: i32, %arg1: memref<8x128xbf16, #tpu.memory_space<vmem>>, %arg2: memref<128x128xbf16, #tpu.memory_space<vmem>>, %arg3: memref<128x128xf32, #tpu.memory_space<vmem>>, %arg4: memref<1x128xf32, #tpu.memory_space<vmem>>, %arg5: memref<8x128xf32, #tpu.memory_space<vmem>>, %arg6: memref<8x128xf32, #tpu.memory_space<vmem>>) attributes {dimension_semantics = [#tpu.dimension_semantics<arbitrary>], iteration_bounds = array<i64: 1>, scalar_prefetch = 0 : i64, scratch_operands = 1 : i64, tpu.core_type = #tpu.core_type<tc>, window_params = [{transform_indices = @transform_0, window_bounds = array<i64: 8, 128>}, {transform_indices = @transform_1, window_bounds = array<i64: 128, 128>}, {pipeline_mode = #tpu.pipeline_mode<synchronous>, transform_indices = @transform_2, window_bounds = array<i64: 128, 128>}, {pipeline_mode = #tpu.pipeline_mode<synchronous>, transform_indices = @transform_3, window_bounds = array<i64: 1, 128>}, {pipeline_mode = #tpu.pipeline_mode<synchronous>, transform_indices = @transform_4, window_bounds = array<i64: 8, 128>}]} {
    %c0_i32 = arith.constant 0 : i32
    %0 = arith.cmpi eq, %arg0, %c0_i32 : i32
    %1 = arith.extui %0 : i1 to i32
    %c0_i32_0 = arith.constant 0 : i32
    %2 = arith.cmpi ne, %1, %c0_i32_0 : i32
    scf.if %2 {
      %cst_10 = arith.constant 0.000000e+00 : f32
      %12 = vector.broadcast %cst_10 : f32 to vector<8x128xf32>
      %c0_11 = arith.constant 0 : index
      %c0_12 = arith.constant 0 : index
      %13 = vector.load %arg6[%c0_11, %c0_12] : memref<8x128xf32, #tpu.memory_space<vmem>>, vector<8x128xf32>
      tpu.vector_store %arg6[%c0_11, %c0_12], %12 {strides = array<i32>} : memref<8x128xf32, #tpu.memory_space<vmem>>, vector<8x128xf32>,
    } else {
    }
    %c0 = arith.constant 0 : index
    %c0_1 = arith.constant 0 : index
    %3 = vector.load %arg6[%c0, %c0_1] : memref<8x128xf32, #tpu.memory_space<vmem>>, vector<8x128xf32>
    %c0_2 = arith.constant 0 : index
    %c0_3 = arith.constant 0 : index
    %4 = vector.load %arg1[%c0_2, %c0_3] : memref<8x128xbf16, #tpu.memory_space<vmem>>, vector<8x128xbf16>
    %c0_4 = arith.constant 0 : index
    %c0_5 = arith.constant 0 : index
    %5 = vector.load %arg2[%c0_4, %c0_5] : memref<128x128xbf16, #tpu.memory_space<vmem>>, vector<128x128xbf16>
    %cst = arith.constant dense<0.000000e+00> : vector<8x128xf32>
    %6 = tpu.matmul %4, %5, %cst {dimension_numbers = #tpu.dot_dimension_numbers<[1], [0], [0], [1], [0, 0, 1, 1], [], []>} : vector<8x128xbf16>, vector<128x128xbf16>, vector<8x128xf32> -> vector<8x128xf32>
    %7 = arith.addf %3, %6 : vector<8x128xf32>
    %c0_6 = arith.constant 0 : index
    %c0_7 = arith.constant 0 : index
    %8 = vector.load %arg6[%c0_6, %c0_7] : memref<8x128xf32, #tpu.memory_space<vmem>>, vector<8x128xf32>
    tpu.vector_store %arg6[%c0_6, %c0_7], %7 {strides = array<i32>} : memref<8x128xf32, #tpu.memory_space<vmem>>, vector<8x128xf32>,
    %c0_i32_8 = arith.constant 0 : i32
    %9 = arith.cmpi eq, %arg0, %c0_i32_8 : i32
    %10 = arith.extui %9 : i1 to i32
    %c0_i32_9 = arith.constant 0 : i32
    %11 = arith.cmpi ne, %10, %c0_i32_9 : i32
    scf.if %11 {
      %c0_10 = arith.constant 0 : index
      %c0_11 = arith.constant 0 : index
      %12 = vector.load %arg6[%c0_10, %c0_11] : memref<8x128xf32, #tpu.memory_space<vmem>>, vector<8x128xf32>
      %c0_12 = arith.constant 0 : index
      %c0_13 = arith.constant 0 : index
      %13 = vector.load %arg3[%c0_12, %c0_13] : memref<128x128xf32, #tpu.memory_space<vmem>>, vector<128x128xf32>
      %cst_14 = arith.constant dense<0.000000e+00> : vector<8x128xf32>
      %14 = tpu.matmul %12, %13, %cst_14 {dimension_numbers = #tpu.dot_dimension_numbers<[1], [0], [0], [1], [0, 0, 1, 1], [], []>} : vector<8x128xf32>, vector<128x128xf32>, vector<8x128xf32> -> vector<8x128xf32>
      %c0_15 = arith.constant 0 : index
      %c0_16 = arith.constant 0 : index
      %15 = vector.load %arg4[%c0_15, %c0_16] : memref<1x128xf32, #tpu.memory_space<vmem>>, vector<1x128xf32>
      %16 = vector.broadcast %15 : vector<1x128xf32> to vector<8x128xf32>
      %17 = arith.addf %14, %16 : vector<8x128xf32>
      %c0_17 = arith.constant 0 : index
      %c0_18 = arith.constant 0 : index
      %18 = vector.load %arg5[%c0_17, %c0_18] : memref<8x128xf32, #tpu.memory_space<vmem>>, vector<8x128xf32>
      tpu.vector_store %arg5[%c0_17, %c0_18], %17 {strides = array<i32>} : memref<8x128xf32, #tpu.memory_space<vmem>>, vector<8x128xf32>,
    } else {
    }
    return
  }
  func.func @transform_0(%arg0: i32) -> (i32, i32) {
    %c0_i32 = arith.constant 0 : i32
    %c0_i32_0 = arith.constant 0 : i32
    return %c0_i32, %arg0 : i32, i32
  }
  func.func @transform_1(%arg0: i32) -> (i32, i32) {
    %c0_i32 = arith.constant 0 : i32
    %c0_i32_0 = arith.constant 0 : i32
    return %arg0, %c0_i32 : i32, i32
  }
  func.func @transform_2(%arg0: i32) -> (i32, i32) {
    %c0_i32 = arith.constant 0 : i32
    %c0_i32_0 = arith.constant 0 : i32
    %c0_i32_1 = arith.constant 0 : i32
    return %c0_i32, %c0_i32_0 : i32, i32
  }
  func.func @transform_3(%arg0: i32) -> (i32, i32) {
    %c0_i32 = arith.constant 0 : i32
    %c0_i32_0 = arith.constant 0 : i32
    %c0_i32_1 = arith.constant 0 : i32
    return %c0_i32, %c0_i32_0 : i32, i32
  }
  func.func @transform_4(%arg0: i32) -> (i32, i32) {
    %c0_i32 = arith.constant 0 : i32
    %c0_i32_0 = arith.constant 0 : i32
    %c0_i32_1 = arith.constant 0 : i32
    return %c0_i32, %c0_i32_0 : i32, i32
  }
}

</mosaic_0001>

<bundles_post_ra>
// kernel: graphsage_forward.5
= control target key start
LH: loop header
LB: loop body
LE: loop exit
PB: predicated region body
PF: predicated region fallthrough
CT: control target
= control target key end

     0   :  { %s299_s1 = inlined_call_operand.vmem [shape: bf16[128,128], index: 1, kind: input, shape index: {}]   ;;  %s300_s2 = inlined_call_operand.vmem [shape: f32[128,128], index: 2, kind: input, shape index: {}]   ;;  %s301_s0 = inlined_call_operand.vmem [shape: bf16[8,128], index: 0, kind: input, shape index: {}]   ;;  %s302_s3 = inlined_call_operand.vmem [shape: f32[1,128], index: 3, kind: input, shape index: {}]   ;;  %s303_s4 = inlined_call_operand.vmem [shape: f32[8,128], index: 4, kind: output, shape index: {}]  }
   0x1   :  { %v191_v0 = vld [vmem:[%s299_s1 + $0x38] sm:$0xff]  ;;  %v190_v1 = vld [vmem:[%s299_s1 + $0x30] sm:$0xff]  ;;  %v120_v4 = vld [vmem:[%s300_s2 + $0x68] sm:$0xff] }
   0x2   :  { %88 = vmatpush.bf16.msra.mxu0 %v191_v0  ;;  %v122_v2 = vld [vmem:[%s300_s2 + $0x78] sm:$0xff]  ;;  %v121_v3 = vld [vmem:[%s300_s2 + $0x70] sm:$0xff]  ;;  %v189_v5 = vld [vmem:[%s299_s1 + $0x28] sm:$0xff] }
   0x3   :  { %127 = vmatpush.msra.mxu1 %v122_v2  ;;  %v119_v6 = vld [vmem:[%s300_s2 + $0x60] sm:$0xff]  ;;  %v118_v7 = vld [vmem:[%s300_s2 + $0x58] sm:$0xff]  ;;  %v117_v9 = vld [vmem:[%s300_s2 + $0x50] sm:$0xff] }
   0x4   :  { %v188_v8 = vld [vmem:[%s299_s1 + $0x20] sm:$0xff]  ;;  %v116_v10 = vld [vmem:[%s300_s2 + $0x48] sm:$0xff]  ;;  %v187_v11 = vld [vmem:[%s299_s1 + $0x18] sm:$0xff] }
   0x5   :  { %128 = vmatpush.msra.mxu1 %v121_v3  ;;  %v115_v12 = vld [vmem:[%s300_s2 + $0x40] sm:$0xff]  ;;  %v114_v13 = vld [vmem:[%s300_s2 + $0x38] sm:$0xff]  ;;  %v186_v14 = vld [vmem:[%s299_s1 + $0x10] sm:$0xff] }
   0x6   :  { %89 = vmatpush.bf16.msra.mxu0 %v190_v1  ;;  %v113_v15 = vld [vmem:[%s300_s2 + $0x30] sm:$0xff]  ;;  %v112_v16 = vld [vmem:[%s300_s2 + $0x28] sm:$0xff]  ;;  %v111_v18 = vld [vmem:[%s300_s2 + $0x20] sm:$0xff] }
   0x7   :  { %129 = vmatpush.msra.mxu1 %v120_v4  ;;  %v185_v17 = vld [vmem:[%s299_s1 + $0x8] sm:$0xff]  ;;  %v110_v19 = vld [vmem:[%s300_s2 + $0x18] sm:$0xff]  ;;  %v184_v20 = vld [vmem:[%s299_s1] sm:$0xff] }
   0x8   :  { %v109_v21 = vld [vmem:[%s300_s2 + $0x10] sm:$0xff]  ;;  %v108_v22 = vld [vmem:[%s300_s2 + $0x8] sm:$0xff]  ;;  %v23_v23 = vld [vmem:[%s301_s0] sm:$0xf] }
   0x9   :  { %130 = vmatpush.msra.mxu1 %v119_v6  ;;  %v107_v24 = vld [vmem:[%s300_s2] sm:$0xff] }
   0xa   :  { %90 = vmatpush.bf16.msra.mxu0 %v189_v5  ;;  %v192_v27 = vld [vmem:[%s302_s3] ss:$0 sm:$0xff] }
   0xb   :  { %131 = vmatpush.msra.mxu1 %v118_v7 }
   0xd   :  { %132 = vmatpush.msra.mxu1 %v117_v9 }
   0xe   :  { %91 = vmatpush.bf16.msra.mxu0 %v188_v8 }
   0xf   :  { %133 = vmatpush.msra.mxu1 %v116_v10 }
  0x11   :  { %134 = vmatpush.msra.mxu1 %v115_v12 }
  0x12   :  { %92 = vmatpush.bf16.msra.mxu0 %v187_v11 }
  0x13   :  { %135 = vmatpush.msra.mxu1 %v114_v13 }
  0x15   :  { %136 = vmatpush.msra.mxu1 %v113_v15 }
  0x16   :  { %93 = vmatpush.bf16.msra.mxu0 %v186_v14 }
  0x17   :  { %137 = vmatpush.msra.mxu1 %v112_v16 }
  0x19   :  { %138 = vmatpush.msra.mxu1 %v111_v18 }
  0x1a   :  { %94 = vmatpush.bf16.msra.mxu0 %v185_v17 }
  0x1b   :  { %139 = vmatpush.msra.mxu1 %v110_v19 }
  0x1d   :  { %140 = vmatpush.msra.mxu1 %v109_v21 }
  0x1e   :  { %95 = vmatpush.bf16.msra.mxu0 %v184_v20 }
  0x1f   :  { %141 = vmatpush.msra.mxu1 %v108_v22 }
  0x21   :  { %96 = vmatmul.bf16.vlgmr.msra.gmra.mxu0 %v23_v23  ;;  %142 = vmatpush.msra.mxu1 %v107_v24 }
  0x9e   :  { %v97_v25 = vpop.f32.mrf.mxu0 }
  0x9f   :  { %143 = vmatmul.f32.vlgmr.msra.gmra.mxu1 %v97_v25 }
  0xa6   :  { %v99_v26 = vpop.f32.mrf.mxu0 }
 0x11c   :  { %v144_v28 = vpop.f32.mrf.mxu1 }
 0x11d   :  { %v145_v29 = vadd.f32 %v192_v27, %v144_v28 }
 0x11f   :  { %147 = vst [vmem:[%s303_s4] sm:$0xff] %v145_v29 }

// kernel: graphsage_forward.3
= control target key start
LH: loop header
LB: loop body
LE: loop exit
PB: predicated region body
PF: predicated region fallthrough
CT: control target
= control target key end

     0   :  { %v1140_v0 = vmov 0.0   ;;  %s1395_s0 = inlined_call_operand.<no memory space> [shape: s32[1], index: 0, kind: input, shape index: {}]   ;;  %s1396_s1 = inlined_call_operand.<no memory space> [shape: s32[1], index: 1, kind: input, shape index: {}]   ;;  %s1397_s4 = inlined_call_operand.vmem [shape: bf16[128,128], index: 4, kind: input, shape index: {}, may-alias: {3,4}]   ;;  %s1398_s5 = inlined_call_operand.vmem [shape: f32[128,1], index: 5, kind: input, shape index: {}]   ;;  %s1399_s6 = inlined_call_operand.vmem [shape: bf16[128,128], index: 6, kind: input, shape index: {}]   ;;  %s1400_s7 = inlined_call_operand.vmem [shape: bf16[128,128], index: 7, kind: input, shape index: {}]   ;;  %s1401_s8 = inlined_call_operand.vmem [shape: f32[1,128], index: 8, kind: input, shape index: {}]   ;;  %s1402_s9 = inlined_call_operand.vmem [shape: bf16[128,128], index: 9, kind: output, shape index: {}]   ;;  %s1403_s2 = inlined_call_operand.vmem [shape: bf16[128,128], index: 2, kind: input, shape index: {}]   ;;  %s1404_s3 = inlined_call_operand.vmem [shape: bf16[128,128], index: 3, kind: input, shape index: {}, may-alias: {3,4}]  }
   0x1   :  { %p63_p0 = scmp.lt.s32.totalorder %s1395_s0, 0  ;;  %s843_s13 = sshll.u32 %s1395_s0, 4  ;;  %83 = vst [vmem:[#allocation2 + $0x30] sm:$0xff] %v1140_v0 }
   0x2   :  { %p72_p1 = scmp.lt.s32.totalorder %s843_s13, 15  ;;  %84 = vst [vmem:[#allocation2] sm:$0xff] %v1140_v0  ;;  %p846_p2 = scmp.le.s32.totalorder %s1396_s1, 0 }
   0x3   :  { %s1406_s0 = smov (!%p63_p0, %s1395_s0), 0  ;;  %85 = vst [vmem:[#allocation2 + $0x58] sm:$0xff] %v1140_v0 }
   0x4   :  { %s1408_s13 = smov (!%p72_p1, %s843_s13), 15  ;;  %86 = vst [vmem:[#allocation2 + $0x18] sm:$0xff] %v1140_v0  ;;  %s842_s16 = sshll.u32 %s1406_s0, 2 }
   0x5   :  { %87 = vst [vmem:[#allocation2 + $0x50] sm:$0xff] %v1140_v0  ;;  %s1204_s19 = scalar_lea.vmem %s1403_s2, %s842_s16  ;;  %s844_s20 = sshll.u32 %s1408_s13, 2 }
   0x6   :  { %88 = vst [vmem:[#allocation2 + $0x68] sm:$0xff] %v1140_v0  ;;  %s1209_s23 = scalar_lea.vmem %s1404_s3, %s844_s20 }
   0x7   :  { %89 = vst [vmem:[#allocation2 + $0x8] sm:$0xff] %v1140_v0 }
   0x8   :  { %90 = vst [vmem:[#allocation2 + $0x48] sm:$0xff] %v1140_v0 }
   0x9   :  { %91 = vst [vmem:[#allocation2 + $0x40] sm:$0xff] %v1140_v0 }
   0xa   :  { %92 = vst [vmem:[#allocation2 + $0x20] sm:$0xff] %v1140_v0 }
   0xb   :  { %93 = vst [vmem:[#allocation2 + $0x10] sm:$0xff] %v1140_v0 }
   0xc   :  { %94 = vst [vmem:[#allocation2 + $0x38] sm:$0xff] %v1140_v0  ;;  %103 = sbr.rel (%p846_p2) target bundleno = 210 (0xd2), region = 37 }
   0xd   :  { %95 = vst [vmem:[#allocation2 + $0x60] sm:$0xff] %v1140_v0 }
   0xe   :  { %96 = vst [vmem:[#allocation2 + $0x70] sm:$0xff] %v1140_v0 }
   0xf   :  { %97 = vst [vmem:[#allocation2 + $0x78] sm:$0xff] %v1140_v0 }
  0x10   :  { %98 = vst [vmem:[#allocation2 + $0x28] sm:$0xff] %v1140_v0 }
  0x11   :  { %v1022_v1 = vld [vmem:[%s1209_s23 + $0x38] sm:$0xff]  ;;  %v1021_v2 = vld [vmem:[%s1209_s23 + $0x30] sm:$0xff]  ;;  %v1020_v3 = vld [vmem:[%s1209_s23 + $0x28] sm:$0xff] }
  0x12   :  { %248 = vmatpush.bf16.msra.mxu0 %v1022_v1  ;;  %1094 = vmatpush.bf16.msra.mxu1 %v1022_v1  ;;  %v1019_v4 = vld [vmem:[%s1209_s23 + $0x20] sm:$0xff]  ;;  %v1018_v5 = vld [vmem:[%s1209_s23 + $0x18] sm:$0xff]  ;;  %v1017_v6 = vld [vmem:[%s1209_s23 + $0x10] sm:$0xff] }
  0x13   :  { %1095 = vmatpush.bf16.msra.mxu2 %v1022_v1  ;;  %1096 = vmatpush.bf16.msra.mxu3 %v1022_v1  ;;  %v1016_v7 = vld [vmem:[%s1209_s23 + $0x8] sm:$0xff]  ;;  %v1015_v8 = vld [vmem:[%s1209_s23] sm:$0xff]  ;;  %v1009_v10 = vld [vmem:[%s1204_s19 + $0x10] sm:$0xff] }
  0x14   :  { %v1007_v9 = vld [vmem:[%s1204_s19] sm:$0xff]  ;;  %v1013_v12 = vld [vmem:[%s1204_s19 + $0x30] sm:$0xff]  ;;  %v1008_v13 = vld [vmem:[%s1204_s19 + $0x8] sm:$0xff] }
  0x15   :  { %v1011_v11 = vld [vmem:[%s1204_s19 + $0x20] sm:$0xff]  ;;  %v1010_v14 = vld [vmem:[%s1204_s19 + $0x18] sm:$0xff]  ;;  %v1012_v15 = vld [vmem:[%s1204_s19 + $0x28] sm:$0xff] }
  0x16   :  { %249 = vmatpush.bf16.msra.mxu0 %v1021_v2  ;;  %1097 = vmatpush.bf16.msra.mxu1 %v1021_v2  ;;  %v1014_v16 = vld [vmem:[%s1204_s19 + $0x38] sm:$0xff]  ;;  %v104_v17 = vld [vmem:[#allocation2 + $0x30] sm:$0xff]  ;;  %v112_v23 = vld [vmem:[#allocation2 + $0x40] sm:$0xff] }
  0x17   :  { %1098 = vmatpush.bf16.msra.mxu2 %v1021_v2  ;;  %1099 = vmatpush.bf16.msra.mxu3 %v1021_v2  ;;  %v108_v18 = vld [vmem:[#allocation2 + $0x50] sm:$0xff]  ;;  %v116_v24 = vld [vmem:[#allocation2 + $0x60] sm:$0xff]  ;;  %v109_v26 = vld [vmem:[#allocation2 + $0x68] sm:$0xff] }
  0x18   :  { %v105_v25 = vld [vmem:[#allocation2] sm:$0xff]  ;;  %v117_v36 = vld [vmem:[#allocation2 + $0x70] sm:$0xff]  ;;  %v106_v37 = vld [vmem:[#allocation2 + $0x58] sm:$0xff] }
  0x19   :  { %v113_v35 = vld [vmem:[#allocation2 + $0x20] sm:$0xff]  ;;  %v110_v38 = vld [vmem:[#allocation2 + $0x8] sm:$0xff]  ;;  %v114_v47 = vld [vmem:[#allocation2 + $0x10] sm:$0xff] }
  0x1a   :  { %250 = vmatpush.bf16.msra.mxu0 %v1020_v3  ;;  %1100 = vmatpush.bf16.msra.mxu1 %v1020_v3  ;;  %v118_v48 = vld [vmem:[#allocation2 + $0x78] sm:$0xff]  ;;  %v111_v50 = vld [vmem:[#allocation2 + $0x48] sm:$0xff] }
  0x1b   :  { %1101 = vmatpush.bf16.msra.mxu2 %v1020_v3  ;;  %1102 = vmatpush.bf16.msra.mxu3 %v1020_v3  ;;  %v107_v49 = vld [vmem:[#allocation2 + $0x18] sm:$0xff]  ;;  %v119_v60 = vld [vmem:[#allocation2 + $0x28] sm:$0xff] }
  0x1c   :  { %v115_v59 = vld [vmem:[#allocation2 + $0x38] sm:$0xff] }
  0x1e   :  { %251 = vmatpush.bf16.msra.mxu0 %v1019_v4  ;;  %1103 = vmatpush.bf16.msra.mxu1 %v1019_v4 }
  0x1f   :  { %1104 = vmatpush.bf16.msra.mxu2 %v1019_v4  ;;  %1105 = vmatpush.bf16.msra.mxu3 %v1019_v4 }
  0x22   :  { %252 = vmatpush.bf16.msra.mxu0 %v1018_v5  ;;  %1106 = vmatpush.bf16.msra.mxu1 %v1018_v5 }
  0x23   :  { %1107 = vmatpush.bf16.msra.mxu2 %v1018_v5  ;;  %1108 = vmatpush.bf16.msra.mxu3 %v1018_v5 }
  0x26   :  { %253 = vmatpush.bf16.msra.mxu0 %v1017_v6  ;;  %1109 = vmatpush.bf16.msra.mxu1 %v1017_v6 }
  0x27   :  { %1110 = vmatpush.bf16.msra.mxu2 %v1017_v6  ;;  %1111 = vmatpush.bf16.msra.mxu3 %v1017_v6 }
  0x2a   :  { %254 = vmatpush.bf16.msra.mxu0 %v1016_v7  ;;  %1112 = vmatpush.bf16.msra.mxu1 %v1016_v7 }
  0x2b   :  { %1113 = vmatpush.bf16.msra.mxu2 %v1016_v7  ;;  %1114 = vmatpush.bf16.msra.mxu3 %v1016_v7 }
  0x2e   :  { %255 = vmatpush.bf16.msra.mxu0 %v1015_v8  ;;  %1115 = vmatpush.bf16.msra.mxu1 %v1015_v8 }
  0x2f   :  { %1116 = vmatpush.bf16.msra.mxu2 %v1015_v8  ;;  %1117 = vmatpush.bf16.msra.mxu3 %v1015_v8 }
  0x31   :  { %256 = vmatmul.bf16.vlgmr.msra.gmra.mxu0 %v1007_v9  ;;  %266 = vmatmul.bf16.vlgmr.msra.gmra.mxu1 %v1009_v10 }
  0x32   :  { %276 = vmatmul.bf16.vlgmr.msra.gmra.mxu2 %v1011_v11  ;;  %286 = vmatmul.bf16.vlgmr.msra.gmra.mxu3 %v1013_v12 }
  0x41   :  { %261 = vmatmul.bf16.gmra.mxu0 %v1008_v13  ;;  %271 = vmatmul.bf16.gmra.mxu1 %v1010_v14 }
  0x42   :  { %281 = vmatmul.bf16.gmra.mxu2 %v1012_v15  ;;  %291 = vmatmul.bf16.gmra.mxu3 %v1014_v16 }
  0xae   :  { %v257_v19 = vpop.f32.mrf.mxu0  ;;  %v267_v20 = vpop.f32.mrf.mxu1 }
  0xaf   :  { %v297_v21 = vadd.f32 %v257_v19, %v104_v17  ;;  %v301_v22 = vadd.f32 %v267_v20, %v108_v18 }
  0xb1   :  { %313 = vst [vmem:[#allocation2 + $0x30] sm:$0xff] %v297_v21 }
  0xb2   :  { %317 = vst [vmem:[#allocation2 + $0x50] sm:$0xff] %v301_v22 }
  0xb5   :  { %v277_v27 = vpop.f32.mrf.mxu2  ;;  %v287_v28 = vpop.f32.mrf.mxu3 }
  0xb6   :  { %v305_v29 = vadd.f32 %v277_v27, %v112_v23  ;;  %v309_v30 = vadd.f32 %v287_v28, %v116_v24  ;;  %v259_v31 = vpop.f32.mrf.mxu0  ;;  %v269_v32 = vpop.f32.mrf.mxu1 }
  0xb7   :  { %v298_v33 = vadd.f32 %v259_v31, %v105_v25  ;;  %v302_v34 = vadd.f32 %v269_v32, %v109_v26 }
  0xb8   :  { %321 = vst [vmem:[#allocation2 + $0x40] sm:$0xff] %v305_v29 }
  0xb9   :  { %325 = vst [vmem:[#allocation2 + $0x60] sm:$0xff] %v309_v30 }
  0xba   :  { %314 = vst [vmem:[#allocation2] sm:$0xff] %v298_v33 }
  0xbb   :  { %318 = vst [vmem:[#allocation2 + $0x68] sm:$0xff] %v302_v34 }
  0xbd   :  { %v279_v39 = vpop.f32.mrf.mxu2  ;;  %v289_v40 = vpop.f32.mrf.mxu3 }
  0xbe   :  { %v306_v41 = vadd.f32 %v279_v39, %v113_v35  ;;  %v310_v42 = vadd.f32 %v289_v40, %v117_v36  ;;  %v262_v43 = vpop.f32.mrf.mxu0  ;;  %v272_v44 = vpop.f32.mrf.mxu1 }
  0xbf   :  { %v299_v45 = vadd.f32 %v262_v43, %v106_v37  ;;  %v303_v46 = vadd.f32 %v272_v44, %v110_v38 }
  0xc0   :  { %322 = vst [vmem:[#allocation2 + $0x20] sm:$0xff] %v306_v41 }
  0xc1   :  { %326 = vst [vmem:[#allocation2 + $0x70] sm:$0xff] %v310_v42 }
  0xc2   :  { %315 = vst [vmem:[#allocation2 + $0x58] sm:$0xff] %v299_v45 }
  0xc3   :  { %319 = vst [vmem:[#allocation2 + $0x8] sm:$0xff] %v303_v46 }
  0xc5   :  { %v282_v51 = vpop.f32.mrf.mxu2  ;;  %v292_v52 = vpop.f32.mrf.mxu3 }
  0xc6   :  { %v307_v53 = vadd.f32 %v282_v51, %v114_v47  ;;  %v311_v54 = vadd.f32 %v292_v52, %v118_v48  ;;  %v264_v55 = vpop.f32.mrf.mxu0  ;;  %v274_v56 = vpop.f32.mrf.mxu1 }
  0xc7   :  { %v300_v57 = vadd.f32 %v264_v55, %v107_v49  ;;  %v304_v58 = vadd.f32 %v274_v56, %v111_v50 }
  0xc8   :  { %323 = vst [vmem:[#allocation2 + $0x10] sm:$0xff] %v307_v53 }
  0xc9   :  { %327 = vst [vmem:[#allocation2 + $0x78] sm:$0xff] %v311_v54 }
  0xca   :  { %316 = vst [vmem:[#allocation2 + $0x18] sm:$0xff] %v300_v57 }
  0xcb   :  { %320 = vst [vmem:[#allocation2 + $0x48] sm:$0xff] %v304_v58 }
  0xcd   :  { %v284_v61 = vpop.f32.mrf.mxu2  ;;  %v294_v62 = vpop.f32.mrf.mxu3 }
  0xce   :  { %v308_v63 = vadd.f32 %v284_v61, %v115_v59  ;;  %v312_v0 = vadd.f32 %v294_v62, %v119_v60 }
  0xd0   :  { %324 = vst [vmem:[#allocation2 + $0x38] sm:$0xff] %v308_v63 }
  0xd1   :  { %328 = vst [vmem:[#allocation2 + $0x28] sm:$0xff] %v312_v0 }
  0xd2 PF:  { %v356_v1 = vld [vmem:[%s1398_s5 + $0x40] sm:$0xff]  ;;  %v1141_v3 = vmov 0   ;;  %v358_v4 = vld [vmem:[%s1398_s5 + $0x50] sm:$0xff]  ;;  %v357_v5 = vld [vmem:[%s1398_s5 + $0x48] sm:$0xff] }
  0xd3   :  { %v348_v2 = vld [vmem:[%s1398_s5] sm:$0xff]  ;;  %1137 = vset.pattern.permute.xlu1 %v1141_v3  ;;  %1136 = vset.pattern.permute.xlu0 %v1141_v3  ;;  %v349_v6 = vld [vmem:[%s1398_s5 + $0x8] sm:$0xff]  ;;  %v359_v7 = vld [vmem:[%s1398_s5 + $0x58] sm:$0xff] }
  0xd4   :  { %406 = vperm.xlu0 %1136, %v356_v1   ;;  %366 = vperm.xlu1 %1137, %v348_v2   ;;  %v1046_v8 = vld [vmem:[%s1400_s7 + $0x38] sm:$0xff]  ;;  %v1045_v10 = vld [vmem:[%s1400_s7 + $0x30] sm:$0xff]  ;;  %v1044_v13 = vld [vmem:[%s1400_s7 + $0x28] sm:$0xff] }
  0xd5   :  { %1138 = vset.pattern.permute.xlu2 %v1141_v3  ;;  %v1030_v9 = vld [vmem:[%s1399_s6 + $0x38] sm:$0xff]  ;;  %1118 = vmatpush.bf16.msra.mxu2 %v1046_v8  ;;  %v350_v11 = vld [vmem:[%s1398_s5 + $0x10] sm:$0xff]  ;;  %v360_v14 = vld [vmem:[%s1398_s5 + $0x60] sm:$0xff] }
  0xd6   :  { %416 = vperm.xlu2 %1138, %v358_v4   ;;  %612 = vmatpush.bf16.msra.mxu0 %v1046_v8  ;;  %v351_v12 = vld [vmem:[%s1398_s5 + $0x18] sm:$0xff]  ;;  %v361_v15 = vld [vmem:[%s1398_s5 + $0x68] sm:$0xff]  ;;  %v352_v16 = vld [vmem:[%s1398_s5 + $0x20] sm:$0xff] }
  0xd7   :  { %709 = vmatpush.bf16.msra.mxu1 %v1030_v9  ;;  %1126 = vmatpush.bf16.msra.mxu3 %v1030_v9  ;;  %v353_v17 = vld [vmem:[%s1398_s5 + $0x28] sm:$0xff]  ;;  %v362_v18 = vld [vmem:[%s1398_s5 + $0x70] sm:$0xff]  ;;  %v363_v19 = vld [vmem:[%s1398_s5 + $0x78] sm:$0xff] }
  0xd8   :  { %v354_v20 = vld [vmem:[%s1398_s5 + $0x30] sm:$0xff]  ;;  %v355_v21 = vld [vmem:[%s1398_s5 + $0x38] sm:$0xff]  ;;  %v1043_v22 = vld [vmem:[%s1400_s7 + $0x20] sm:$0xff] }
  0xd9   :  { %1119 = vmatpush.bf16.msra.mxu2 %v1045_v10  ;;  %v1029_v23 = vld [vmem:[%s1399_s6 + $0x30] sm:$0xff]  ;;  %v1042_v24 = vld [vmem:[%s1400_s7 + $0x18] sm:$0xff]  ;;  %v1028_v25 = vld [vmem:[%s1399_s6 + $0x28] sm:$0xff] }
  0xda   :  { %613 = vmatpush.bf16.msra.mxu0 %v1045_v10  ;;  %v1041_v26 = vld [vmem:[%s1400_s7 + $0x10] sm:$0xff]  ;;  %v1027_v27 = vld [vmem:[%s1399_s6 + $0x20] sm:$0xff]  ;;  %v1040_v28 = vld [vmem:[%s1400_s7 + $0x8] sm:$0xff] }
  0xdb   :  { %710 = vmatpush.bf16.msra.mxu1 %v1029_v23  ;;  %1127 = vmatpush.bf16.msra.mxu3 %v1029_v23  ;;  %v1026_v29 = vld [vmem:[%s1399_s6 + $0x18] sm:$0xff]  ;;  %v1039_v30 = vld [vmem:[%s1400_s7] sm:$0xff]  ;;  %v1025_v31 = vld [vmem:[%s1399_s6 + $0x10] sm:$0xff] }
  0xdc   :  { %411 = vperm.xlu0 %1136, %v357_v5   ;;  %371 = vperm.xlu1 %1137, %v349_v6   ;;  %v1035_v32 = vld [vmem:[%s1397_s4 + $0x20] sm:$0xff]  ;;  %v1024_v33 = vld [vmem:[%s1399_s6 + $0x8] sm:$0xff]  ;;  %v1037_v40 = vld [vmem:[%s1397_s4 + $0x30] sm:$0xff] }
  0xdd   :  { %1120 = vmatpush.bf16.msra.mxu2 %v1044_v13  ;;  %v1023_v34 = vld [vmem:[%s1399_s6] sm:$0xff]  ;;  %v1036_v36 = vld [vmem:[%s1397_s4 + $0x28] sm:$0xff]  ;;  %v332_v42 = vld [vmem:[#allocation2 + $0x30] sm:$0xff] }
  0xde   :  { %421 = vperm.xlu2 %1138, %v359_v7   ;;  %614 = vmatpush.bf16.msra.mxu0 %v1044_v13  ;;  %v1031_v35 = vld [vmem:[%s1397_s4] sm:$0xff]  ;;  %v1032_v37 = vld [vmem:[%s1397_s4 + $0x8] sm:$0xff]  ;;  %v1033_v52 = vld [vmem:[%s1397_s4 + $0x10] sm:$0xff] }
  0xdf   :  { %711 = vmatpush.bf16.msra.mxu1 %v1028_v25  ;;  %1128 = vmatpush.bf16.msra.mxu3 %v1028_v25  ;;  %v340_v41 = vld [vmem:[#allocation2 + $0x40] sm:$0xff]  ;;  %v1038_v55 = vld [vmem:[%s1397_s4 + $0x38] sm:$0xff]  ;;  %v342_v56 = vld [vmem:[#allocation2 + $0x10] sm:$0xff] }
  0xe0   :  { %v341_v43 = vld [vmem:[#allocation2 + $0x20] sm:$0xff]  ;;  %v343_v58 = vld [vmem:[#allocation2 + $0x38] sm:$0xff]  ;;  %v345_v8 = vld [vmem:[#allocation2 + $0x70] sm:$0xff] }
  0xe1   :  { %1121 = vmatpush.bf16.msra.mxu2 %v1043_v22  ;;  %v333_v44 = vld [vmem:[#allocation2] sm:$0xff]  ;;  %v334_v60 = vld [vmem:[#allocation2 + $0x58] sm:$0xff]  ;;  %v336_v10 = vld [vmem:[#allocation2 + $0x50] sm:$0xff] }
  0xe2   :  { %615 = vmatpush.bf16.msra.mxu0 %v1043_v22  ;;  %v335_v62 = vld [vmem:[#allocation2 + $0x18] sm:$0xff]  ;;  %v347_v23 = vld [vmem:[#allocation2 + $0x28] sm:$0xff] }
  0xe3   :  { %712 = vmatpush.bf16.msra.mxu1 %v1027_v27  ;;  %1129 = vmatpush.bf16.msra.mxu3 %v1027_v27  ;;  %v1034_v3 = vld [vmem:[%s1397_s4 + $0x18] sm:$0xff]  ;;  %v339_v25 = vld [vmem:[#allocation2 + $0x48] sm:$0xff] }
  0xe4   :  { %376 = vperm.xlu0 %1136, %v350_v11   ;;  %381 = vperm.xlu1 %1137, %v351_v12   ;;  %v344_v11 = vld [vmem:[#allocation2 + $0x60] sm:$0xff]  ;;  %v337_v12 = vld [vmem:[#allocation2 + $0x68] sm:$0xff] }
  0xe5   :  { %1122 = vmatpush.bf16.msra.mxu2 %v1042_v24  ;;  %v338_v27 = vld [vmem:[#allocation2 + $0x8] sm:$0xff] }
  0xe6   :  { %426 = vperm.xlu2 %1138, %v360_v14   ;;  %616 = vmatpush.bf16.msra.mxu0 %v1042_v24 }
  0xe7   :  { %713 = vmatpush.bf16.msra.mxu1 %v1026_v29  ;;  %1130 = vmatpush.bf16.msra.mxu3 %v1026_v29 }
  0xe9   :  { %1123 = vmatpush.bf16.msra.mxu2 %v1041_v26 }
  0xea   :  { %617 = vmatpush.bf16.msra.mxu0 %v1041_v26 }
  0xeb   :  { %714 = vmatpush.bf16.msra.mxu1 %v1025_v31  ;;  %1131 = vmatpush.bf16.msra.mxu3 %v1025_v31 }
  0xec   :  { %431 = vperm.xlu0 %1136, %v361_v15   ;;  %386 = vperm.xlu1 %1137, %v352_v16  }
  0xed   :  { %1124 = vmatpush.bf16.msra.mxu2 %v1040_v28 }
  0xee   :  { %391 = vperm.xlu2 %1138, %v353_v17   ;;  %618 = vmatpush.bf16.msra.mxu0 %v1040_v28 }
  0xef   :  { %715 = vmatpush.bf16.msra.mxu1 %v1024_v33  ;;  %1132 = vmatpush.bf16.msra.mxu3 %v1024_v33 }
  0xf1   :  { %1125 = vmatpush.bf16.msra.mxu2 %v1039_v30 }
  0xf2   :  { %619 = vmatpush.bf16.msra.mxu0 %v1039_v30 }
  0xf3   :  { %716 = vmatpush.bf16.msra.mxu1 %v1023_v34  ;;  %1133 = vmatpush.bf16.msra.mxu3 %v1023_v34 }
  0xf4   :  { %436 = vperm.xlu0 %1136, %v362_v18   ;;  %441 = vperm.xlu1 %1137, %v363_v19  }
  0xf5   :  { %640 = vmatmul.bf16.vlgmr.msra.gmra.mxu2 %v1035_v32  ;;  %620 = vmatmul.bf16.vlgmr.msra.gmra.mxu0 %v1031_v35 }
  0xf6   :  { %396 = vperm.xlu2 %1138, %v354_v20  }
  0xfc   :  { %401 = vperm.xlu0 %1136, %v355_v21   ;;  %v346_v21 = vld [vmem:[#allocation2 + $0x78] sm:$0xff] }
 0x105   :  { %645 = vmatmul.bf16.gmra.mxu2 %v1036_v36  ;;  %625 = vmatmul.bf16.gmra.mxu0 %v1032_v37 }
 0x115   :  { %650 = vmatmul.bf16.gmra.mxu2 %v1037_v40  ;;  %630 = vmatmul.bf16.gmra.mxu0 %v1033_v52  ;;  %v1353_v40 = vld [vmem:[%s1401_s8] ss:$0 sm:$0xff] }
 0x125   :  { %655 = vmatmul.bf16.gmra.mxu2 %v1038_v55  ;;  %635 = vmatmul.bf16.gmra.mxu0 %v1034_v3 }
 0x130   :  { %v417_v47 = vpop.permute.xlu2 %416 }
 0x131   :  { %v454_v63 = vmul.f32 %v417_v47, %v342_v56 }
 0x138   :  { %v422_v57 = vpop.permute.xlu2 %421 }
 0x139   :  { %v455_v0 = vmul.f32 %v422_v57, %v343_v58 }
 0x13b   :  { %v465_v5 = vpack.c.bf16 %v455_v0, %v454_v63 }
 0x140   :  { %v427_v6 = vpop.permute.xlu2 %426 }
 0x141   :  { %v456_v16 = vmul.f32 %v427_v6, %v344_v11 }
 0x146   :  { %v407_v38 = vpop.permute.xlu0 %406  ;;  %v367_v39 = vpop.permute.xlu1 %366 }
 0x147   :  { %v452_v48 = vmul.f32 %v407_v38, %v340_v41  ;;  %v444_v49 = vmul.f32 %v367_v39, %v332_v42 }
 0x148   :  { %v392_v15 = vpop.permute.xlu2 %391 }
 0x149   :  { %v449_v17 = vmul.f32 %v392_v15, %v337_v12 }
 0x14e   :  { %v412_v45 = vpop.permute.xlu0 %411  ;;  %v372_v46 = vpop.permute.xlu1 %371 }
 0x14f   :  { %v453_v50 = vmul.f32 %v412_v45, %v341_v43  ;;  %v445_v51 = vmul.f32 %v372_v46, %v333_v44 }
 0x150   :  { %v397_v26 = vpop.permute.xlu2 %396 }
 0x151   :  { %v460_v53 = vpack.c.bf16 %v445_v51, %v444_v49  ;;  %v464_v54 = vpack.c.bf16 %v453_v50, %v452_v48  ;;  %v450_v31 = vmul.f32 %v397_v26, %v338_v27 }
 0x153   :  { %717 = vmatmul.bf16.vlgmr.msra.gmra.mxu1 %v460_v53  ;;  %737 = vmatmul.bf16.vlgmr.msra.gmra.mxu3 %v464_v54 }
 0x156   :  { %v377_v59 = vpop.permute.xlu0 %376  ;;  %v382_v61 = vpop.permute.xlu1 %381 }
 0x157   :  { %v446_v1 = vmul.f32 %v377_v59, %v334_v60  ;;  %v447_v2 = vmul.f32 %v382_v61, %v335_v62 }
 0x159   :  { %v461_v4 = vpack.c.bf16 %v447_v2, %v446_v1 }
 0x15e   :  { %v432_v7 = vpop.permute.xlu0 %431  ;;  %v387_v9 = vpop.permute.xlu1 %386 }
 0x15f   :  { %v457_v13 = vmul.f32 %v432_v7, %v345_v8  ;;  %v448_v14 = vmul.f32 %v387_v9, %v336_v10 }
 0x161   :  { %v462_v19 = vpack.c.bf16 %v449_v17, %v448_v14  ;;  %v466_v20 = vpack.c.bf16 %v457_v13, %v456_v16 }
 0x163   :  { %722 = vmatmul.bf16.gmra.mxu1 %v461_v4  ;;  %742 = vmatmul.bf16.gmra.mxu3 %v465_v5 }
 0x166   :  { %v437_v18 = vpop.permute.xlu0 %436  ;;  %v442_v22 = vpop.permute.xlu1 %441 }
 0x167   :  { %v458_v28 = vmul.f32 %v437_v18, %v346_v21  ;;  %v459_v29 = vmul.f32 %v442_v22, %v347_v23 }
 0x169   :  { %v467_v33 = vpack.c.bf16 %v459_v29, %v458_v28 }
 0x16e   :  { %v402_v24 = vpop.permute.xlu0 %401 }
 0x16f   :  { %v451_v30 = vmul.f32 %v402_v24, %v339_v25 }
 0x171   :  { %v463_v32 = vpack.c.bf16 %v451_v30, %v450_v31 }
 0x172   :  { %v621_v34 = vpop.f32.mrf.mxu0 }
 0x173   :  { %727 = vmatmul.bf16.gmra.mxu1 %v462_v19  ;;  %747 = vmatmul.bf16.gmra.mxu3 %v466_v20 }
 0x178   :  { %v641_v35 = vpop.f32.mrf.mxu2 }
 0x17a   :  { %v623_v36 = vpop.f32.mrf.mxu0 }
 0x180   :  { %v643_v38 = vpop.f32.mrf.mxu2 }
 0x182   :  { %v626_v42 = vpop.f32.mrf.mxu0 }
 0x183   :  { %732 = vmatmul.bf16.gmra.mxu1 %v463_v32  ;;  %752 = vmatmul.bf16.gmra.mxu3 %v467_v33 }
 0x188   :  { %v646_v48 = vpop.f32.mrf.mxu2 }
 0x18a   :  { %v628_v56 = vpop.f32.mrf.mxu0 }
 0x190   :  { %v648_v62 = vpop.f32.mrf.mxu2 }
 0x192   :  { %v631_v3 = vpop.f32.mrf.mxu0 }
 0x198   :  { %v651_v12 = vpop.f32.mrf.mxu2 }
 0x19a   :  { %v633_v17 = vpop.f32.mrf.mxu0 }
 0x1a0   :  { %v653_v24 = vpop.f32.mrf.mxu2 }
 0x1a2   :  { %v636_v29 = vpop.f32.mrf.mxu0 }
 0x1d0   :  { %v718_v37 = vpop.f32.mrf.mxu1 }
 0x1d1   :  { %v719_v39 = vadd.f32 %v718_v37, %v621_v34 }
 0x1d3   :  { %v762_v44 = vadd.f32 %v1353_v40, %v719_v39 }
 0x1d5   :  { %v778_v49 = vmax.f32 %v762_v44, 0.0 }
 0x1d6   :  { %v738_v41 = vpop.f32.mrf.mxu3 }
 0x1d7   :  { %v739_v46 = vadd.f32 %v738_v41, %v641_v35 }
 0x1d8   :  { %v720_v43 = vpop.f32.mrf.mxu1 }
 0x1d9   :  { %v721_v45 = vadd.f32 %v720_v43, %v623_v36  ;;  %v770_v52 = vadd.f32 %v1353_v40, %v739_v46  ;;  %v638_v43 = vpop.f32.mrf.mxu0 }
 0x1db   :  { %v763_v47 = vadd.f32 %v1353_v40, %v721_v45  ;;  %v786_v58 = vmax.f32 %v770_v52, 0.0 }
 0x1dd   :  { %v779_v50 = vmax.f32 %v763_v47, 0.0 }
 0x1de   :  { %v740_v51 = vpop.f32.mrf.mxu3 }
 0x1df   :  { %v1050_v53 = vpack.c.bf16 %v779_v50, %v778_v49  ;;  %v741_v54 = vadd.f32 %v740_v51, %v643_v38  ;;  %v656_v38 = vpop.f32.mrf.mxu2 }
 0x1e0   :  { %v723_v55 = vpop.f32.mrf.mxu1 }
 0x1e1   :  { %1051 = vst [vmem:[%s1402_s9] sm:$0xff] %v1050_v53   ;;  %v771_v57 = vadd.f32 %v1353_v40, %v741_v54  ;;  %v724_v61 = vadd.f32 %v723_v55, %v626_v42 }
 0x1e3   :  { %v787_v59 = vmax.f32 %v771_v57, 0.0  ;;  %v764_v1 = vadd.f32 %v1353_v40, %v724_v61 }
 0x1e5   :  { %v1070_v60 = vpack.c.bf16 %v787_v59, %v786_v58  ;;  %v780_v6 = vmax.f32 %v764_v1, 0.0 }
 0x1e6   :  { %v743_v63 = vpop.f32.mrf.mxu3 }
 0x1e7   :  { %1090 = vst [vmem:[%s1402_s9 + $0x20] sm:$0xff] %v1070_v60   ;;  %v744_v4 = vadd.f32 %v743_v63, %v646_v48  ;;  %v658_v51 = vpop.f32.mrf.mxu2 }
 0x1e8   :  { %v725_v0 = vpop.f32.mrf.mxu1 }
 0x1e9   :  { %v726_v2 = vadd.f32 %v725_v0, %v628_v56  ;;  %v772_v9 = vadd.f32 %v1353_v40, %v744_v4 }
 0x1eb   :  { %v765_v5 = vadd.f32 %v1353_v40, %v726_v2  ;;  %v788_v15 = vmax.f32 %v772_v9, 0.0 }
 0x1ed   :  { %v781_v7 = vmax.f32 %v765_v5, 0.0 }
 0x1ee   :  { %v745_v8 = vpop.f32.mrf.mxu3 }
 0x1ef   :  { %v1055_v10 = vpack.c.bf16 %v781_v7, %v780_v6  ;;  %v746_v11 = vadd.f32 %v745_v8, %v648_v62 }
 0x1f0   :  { %v728_v13 = vpop.f32.mrf.mxu1 }
 0x1f1   :  { %1087 = vst [vmem:[%s1402_s9 + $0x8] sm:$0xff] %v1055_v10   ;;  %v773_v14 = vadd.f32 %v1353_v40, %v746_v11  ;;  %v729_v19 = vadd.f32 %v728_v13, %v631_v3 }
 0x1f3   :  { %v789_v16 = vmax.f32 %v773_v14, 0.0  ;;  %v766_v22 = vadd.f32 %v1353_v40, %v729_v19 }
 0x1f5   :  { %v1075_v18 = vpack.c.bf16 %v789_v16, %v788_v15  ;;  %v782_v27 = vmax.f32 %v766_v22, 0.0 }
 0x1f6   :  { %v748_v20 = vpop.f32.mrf.mxu3 }
 0x1f7   :  { %1091 = vst [vmem:[%s1402_s9 + $0x28] sm:$0xff] %v1075_v18   ;;  %v749_v25 = vadd.f32 %v748_v20, %v651_v12 }
 0x1f8   :  { %v730_v21 = vpop.f32.mrf.mxu1 }
 0x1f9   :  { %v731_v23 = vadd.f32 %v730_v21, %v633_v17  ;;  %v774_v31 = vadd.f32 %v1353_v40, %v749_v25 }
 0x1fb   :  { %v767_v26 = vadd.f32 %v1353_v40, %v731_v23  ;;  %v790_v36 = vmax.f32 %v774_v31, 0.0 }
 0x1fd   :  { %v783_v28 = vmax.f32 %v767_v26, 0.0 }
 0x1fe   :  { %v750_v30 = vpop.f32.mrf.mxu3 }
 0x1ff   :  { %v1060_v32 = vpack.c.bf16 %v783_v28, %v782_v27  ;;  %v751_v33 = vadd.f32 %v750_v30, %v653_v24 }
 0x200   :  { %v733_v34 = vpop.f32.mrf.mxu1 }
 0x201   :  { %1088 = vst [vmem:[%s1402_s9 + $0x10] sm:$0xff] %v1060_v32   ;;  %v775_v35 = vadd.f32 %v1353_v40, %v751_v33  ;;  %v734_v41 = vadd.f32 %v733_v34, %v636_v29 }
 0x203   :  { %v791_v37 = vmax.f32 %v775_v35, 0.0  ;;  %v768_v45 = vadd.f32 %v1353_v40, %v734_v41 }
 0x205   :  { %v1080_v39 = vpack.c.bf16 %v791_v37, %v790_v36  ;;  %v784_v49 = vmax.f32 %v768_v45, 0.0 }
 0x206   :  { %v753_v42 = vpop.f32.mrf.mxu3 }
 0x207   :  { %1092 = vst [vmem:[%s1402_s9 + $0x30] sm:$0xff] %v1080_v39   ;;  %v754_v47 = vadd.f32 %v753_v42, %v656_v38 }
 0x208   :  { %v735_v44 = vpop.f32.mrf.mxu1 }
 0x209   :  { %v736_v46 = vadd.f32 %v735_v44, %v638_v43  ;;  %v776_v53 = vadd.f32 %v1353_v40, %v754_v47 }
 0x20b   :  { %v769_v48 = vadd.f32 %v1353_v40, %v736_v46  ;;  %v792_v57 = vmax.f32 %v776_v53, 0.0 }
 0x20d   :  { %v785_v50 = vmax.f32 %v769_v48, 0.0 }
 0x20e   :  { %v755_v52 = vpop.f32.mrf.mxu3 }
 0x20f   :  { %v1065_v54 = vpack.c.bf16 %v785_v50, %v784_v49  ;;  %v756_v55 = vadd.f32 %v755_v52, %v658_v51 }
 0x211   :  { %1089 = vst [vmem:[%s1402_s9 + $0x18] sm:$0xff] %v1065_v54   ;;  %v777_v56 = vadd.f32 %v1353_v40, %v756_v55 }
 0x213   :  { %v793_v58 = vmax.f32 %v777_v56, 0.0 }
 0x215   :  { %v1085_v59 = vpack.c.bf16 %v793_v58, %v792_v57 }
 0x217   :  { %1093 = vst [vmem:[%s1402_s9 + $0x38] sm:$0xff] %v1085_v59  }

</bundles_post_ra>
